<compile_context>
chip_gen: v7x
topology: tpu7x:2x2x1
jax: 0.10.0
libtpu: 0.0.40
codegen_flags: <defaults>
</compile_context>

<pallas_src>
import functools

import jax
import jax.numpy as jnp
from jax.experimental import pallas as pl
from jax.experimental.pallas import tpu as pltpu


def _attention_kernel(x_ref, w1t_ref, b1_ref, w2_ref, b2_ref, out_ref, amap_ref):
    # x_ref:   (C, THW)  VMEM  -- channels on sublanes, pixels on lanes
    # w1t_ref: (C, C4)   VMEM  -- conv1 weight, transposed to (in, out), resident
    # b1_ref:  (C4,)     SMEM  -- conv1 bias (scalars)
    # w2_ref:  (C4,)     SMEM  -- conv2 weight (single output channel, scalars)
    # b2_ref:  (1,)      SMEM  -- conv2 bias (scalar)
    # out_ref: (C, THW)  VMEM  -- gated input
    # amap_ref:(1, THW)  VMEM  -- attention map (lane-dense)
    x = x_ref[...].astype(jnp.float32)                     # (C, THW)
    w1t = w1t_ref[...].astype(jnp.float32)                 # (C, C4)
    c4 = w1t.shape[1]
    thw = x.shape[1]

    # conv2 accumulator starts from its bias (broadcast over all lanes).
    a = jnp.full((1, thw), b2_ref[0], jnp.float32)

    # Tiny contractions: (C4, C) @ (C, THW) with C~8, C4~2 would use <2% of an
    # MXU pass, so keep it on the VPU (per-sublane scale) + XLU (sublane reduce).
    # TODO(synk): add an MXU jnp.dot path when C >= 128 and C//4 >= 8.
    for j in range(c4):
        wj = w1t[:, j:j + 1]                               # (C, 1) lane-broadcast col
        h_j = jnp.sum(x * wj, axis=0, keepdims=True)       # (1, THW) sublane reduce
        h_j = jnp.maximum(h_j + b1_ref[j], 0.0)            # conv1 bias + ReLU
        a = a + w2_ref[j] * h_j                            # conv2 scalar FMA
    a = jax.nn.sigmoid(a)                                  # (1, THW) attention (EUP)

    out_ref[...] = (x * a).astype(out_ref.dtype)           # gate (sublane broadcast)
    amap_ref[...] = a.astype(amap_ref.dtype)


def _pick_tile_hw(hw, c, target_bytes):
    """Pick the pixel-axis tile.

    Prefers (a) the full extent when it fits the VMEM budget, then (b) the
    largest multiple-of-128 divisor of hw under the budget (no padded edge
    block), then (c) a non-dividing multiple-of-128 tile (edge block is padded
    on read and masked on write by Pallas)."""
    target_lanes = max(128, (target_bytes // (4 * c)) // 128 * 128)
    if hw <= target_lanes:
        return hw
    t = target_lanes
    while t >= 128:
        if hw % t == 0:
            return t
        t -= 128
    return target_lanes


@functools.partial(jax.jit, static_argnames=("target_tile_bytes",))
def attention_module(x_nchw, w1, b1, w2, b2, *, target_tile_bytes=2 << 20):
    """Pallas implementation of AttentionModule.forward.

    Args:
      x_nchw: (N, C, H, W) input (PyTorch NCHW convention).
      w1: (C//4, C) conv1 weight (PyTorch (out, in) for a 1x1 conv).
      b1: (C//4,)   conv1 bias.
      w2: (1, C//4) conv2 weight.
      b2: (1,)      conv2 bias.

    Returns:
      (out, attention_map) matching (out, self.attention_map) of the module:
        out:           (N, C, H, W)
        attention_map: (N, 1, H, W)
    """
    N, C, H, W = x_nchw.shape
    C4 = w1.shape[0]
    HW = H * W

    # NCHW is already a contiguous (C, H*W) slab per image: free reshape.
    x3d = x_nchw.reshape(N, C, HW)

    # Small parameters: conv1 weight as an (in, out) VMEM block (resident),
    # biases / conv2 weight as SMEM scalars.
    w1t = jnp.transpose(w1, (1, 0)).astype(jnp.float32)    # (C, C4)
    b1_v = b1.reshape(C4).astype(jnp.float32)
    w2_v = w2.reshape(C4).astype(jnp.float32)
    b2_v = b2.reshape(1).astype(jnp.float32)

    tile_hw = _pick_tile_hw(HW, C, target_tile_bytes)
    grid = (N, pl.cdiv(HW, tile_hw))

    out3d, amap3d = pl.pallas_call(
        _attention_kernel,
        out_shape=(
            jax.ShapeDtypeStruct((N, C, HW), x_nchw.dtype),
            jax.ShapeDtypeStruct((N, 1, HW), x_nchw.dtype),
        ),
        grid_spec=pltpu.PrefetchScalarGridSpec(
            num_scalar_prefetch=0,
            grid=grid,
            in_specs=[
                # x tile: channels-in-sublanes, pixels-in-lanes (lane-dense)
                pl.BlockSpec((None, C, tile_hw), lambda n, i: (n, 0, i)),
                # conv1 weight: tiny, constant index map -> stays resident
                pl.BlockSpec((C, C4), lambda n, i: (0, 0)),
                # biases / conv2 weight as SMEM scalars (no padded VMEM vregs)
                pl.BlockSpec(memory_space=pltpu.MemorySpace.SMEM),
                pl.BlockSpec(memory_space=pltpu.MemorySpace.SMEM),
                pl.BlockSpec(memory_space=pltpu.MemorySpace.SMEM),
            ],
            out_specs=[
                pl.BlockSpec((None, C, tile_hw), lambda n, i: (n, 0, i)),
                # attention map: (1, tile_hw) block -> unmasked lane-dense stores
                pl.BlockSpec((None, 1, tile_hw), lambda n, i: (n, 0, i)),
            ],
        ),
        compiler_params=pltpu.CompilerParams(
            # Both grid axes independent -> shard across TensorCores (megacore).
            dimension_semantics=("parallel", "parallel"),
            vmem_limit_bytes=32 * 1024 * 1024,
        ),
    )(x3d, w1t, b1_v, w2_v, b2_v)

    # Free reshapes back to NCHW / N1HW.
    return out3d.reshape(N, C, H, W), amap3d.reshape(N, 1, H, W)


def _reference(x_nchw, w1, b1, w2, b2):
    """Plain-JAX reference mirroring the PyTorch forward exactly."""
    h = jnp.einsum("nchw,oc->nohw", x_nchw, w1) + b1[None, :, None, None]
    h = jax.nn.relu(h)
    a = jnp.einsum("nchw,oc->nohw", h, w2) + b2[None, :, None, None]
    a = jax.nn.sigmoid(a)
    return x_nchw * a, a


if __name__ == "__main__":
    # Small shapes consistent with the module: batch=2, channels=8, spatial=16.
    N, C, H, W = 2, 8, 16, 16
    C4 = C // 4

    key = jax.random.PRNGKey(0)
    kx, kw1, kb1, kw2, kb2 = jax.random.split(key, 5)

    x = jax.random.normal(kx, (N, C, H, W), dtype=jnp.float32)
    # PyTorch Conv2d weight is (out, in, 1, 1); trivial 1x1 kernel dims dropped.
    w1 = jax.random.normal(kw1, (C4, C), dtype=jnp.float32) * 0.3
    b1 = jax.random.normal(kb1, (C4,), dtype=jnp.float32) * 0.1
    w2 = jax.random.normal(kw2, (1, C4), dtype=jnp.float32) * 0.3
    b2 = jax.random.normal(kb2, (1,), dtype=jnp.float32) * 0.1

    out, amap = attention_module(x, w1, b1, w2, b2)
    out = jax.block_until_ready(out)
    amap = jax.block_until_ready(amap)

    ref_out, ref_amap = _reference(x, w1, b1, w2, b2)
    assert out.shape == (N, C, H, W)
    assert amap.shape == (N, 1, H, W)
    assert jnp.allclose(out, ref_out, atol=1e-5, rtol=1e-5)
    assert jnp.allclose(amap, ref_amap, atol=1e-5, rtol=1e-5)

    print("KERNEL_OK")
</pallas_src>

<mosaic_0001>
module attributes {stable_mosaic.version = 11 : i64} {
  func.func @_attention_kernel(%arg0: i32, %arg1: i32, %arg2: memref<1x8x256xf32, #tpu.memory_space<vmem>>, %arg3: memref<8x2xf32, #tpu.memory_space<vmem>>, %arg4: memref<2xf32, #tpu.memory_space<smem>>, %arg5: memref<2xf32, #tpu.memory_space<smem>>, %arg6: memref<1xf32, #tpu.memory_space<smem>>, %arg7: memref<1x8x256xf32, #tpu.memory_space<vmem>>, %arg8: memref<1x1x256xf32, #tpu.memory_space<vmem>>) attributes {dimension_semantics = [#tpu.dimension_semantics<parallel>, #tpu.dimension_semantics<parallel>], iteration_bounds = array<i64: 2, 1>, scalar_prefetch = 0 : i64, scratch_operands = 0 : i64, tpu.core_type = #tpu.core_type<tc>, window_params = [{transform_indices = @transform_0, window_bounds = array<i64: 1, 8, 256>}, {pipeline_mode = #tpu.pipeline_mode<synchronous>, transform_indices = @transform_1, window_bounds = array<i64: 8, 2>}, {transform_indices = @transform_2, window_bounds = array<i64: 2>}, {transform_indices = @transform_3, window_bounds = array<i64: 2>}, {transform_indices = @transform_4, window_bounds = array<i64: 1>}, {transform_indices = @transform_5, window_bounds = array<i64: 1, 8, 256>}, {transform_indices = @transform_6, window_bounds = array<i64: 1, 1, 256>}]} {
    %c0 = arith.constant 0 : index
    %c0_0 = arith.constant 0 : index
    %c0_1 = arith.constant 0 : index
    %0 = vector.load %arg2[%c0, %c0_0, %c0_1] : memref<1x8x256xf32, #tpu.memory_space<vmem>>, vector<1x8x256xf32>
    %1 = vector.shape_cast %0 : vector<1x8x256xf32> to vector<8x256xf32>
    %c0_2 = arith.constant 0 : index
    %c0_3 = arith.constant 0 : index
    %2 = vector.load %arg3[%c0_2, %c0_3] : memref<8x2xf32, #tpu.memory_space<vmem>>, vector<8x2xf32>
    %c0_4 = arith.constant 0 : index
    %3 = memref.load %arg6[%c0_4] : memref<1xf32, #tpu.memory_space<smem>>
    %4 = vector.broadcast %3 : f32 to vector<1x256xf32>
    %5 = vector.extract_strided_slice %2 {offsets = [0, 0], sizes = [8, 1], strides = [1, 1]} : vector<8x2xf32> to vector<8x1xf32>
    %6 = vector.broadcast %5 : vector<8x1xf32> to vector<8x256xf32>
    %7 = arith.mulf %1, %6 : vector<8x256xf32>
    %cst = arith.constant dense<0.000000e+00> : vector<256xf32>
    %8 = vector.multi_reduction <add>, %7, %cst [0] : vector<8x256xf32> to vector<256xf32>
    %9 = vector.shape_cast %8 : vector<256xf32> to vector<1x256xf32>
    %c0_5 = arith.constant 0 : index
    %10 = memref.load %arg4[%c0_5] : memref<2xf32, #tpu.memory_space<smem>>
    %11 = vector.broadcast %10 : f32 to vector<1x256xf32>
    %12 = arith.addf %9, %11 : vector<1x256xf32>
    %cst_6 = arith.constant 0.000000e+00 : f32
    %13 = vector.broadcast %cst_6 : f32 to vector<1x256xf32>
    %14 = arith.maximumf %12, %13 : vector<1x256xf32>
    %c0_7 = arith.constant 0 : index
    %15 = memref.load %arg5[%c0_7] : memref<2xf32, #tpu.memory_space<smem>>
    %16 = vector.broadcast %15 : f32 to vector<1x256xf32>
    %17 = arith.mulf %16, %14 : vector<1x256xf32>
    %18 = arith.addf %4, %17 : vector<1x256xf32>
    %19 = vector.extract_strided_slice %2 {offsets = [0, 1], sizes = [8, 1], strides = [1, 1]} : vector<8x2xf32> to vector<8x1xf32>
    %20 = vector.broadcast %19 : vector<8x1xf32> to vector<8x256xf32>
    %21 = arith.mulf %1, %20 : vector<8x256xf32>
    %cst_8 = arith.constant dense<0.000000e+00> : vector<256xf32>
    %22 = vector.multi_reduction <add>, %21, %cst_8 [0] : vector<8x256xf32> to vector<256xf32>
    %23 = vector.shape_cast %22 : vector<256xf32> to vector<1x256xf32>
    %c1 = arith.constant 1 : index
    %24 = memref.load %arg4[%c1] : memref<2xf32, #tpu.memory_space<smem>>
    %25 = vector.broadcast %24 : f32 to vector<1x256xf32>
    %26 = arith.addf %23, %25 : vector<1x256xf32>
    %cst_9 = arith.constant 0.000000e+00 : f32
    %27 = vector.broadcast %cst_9 : f32 to vector<1x256xf32>
    %28 = arith.maximumf %26, %27 : vector<1x256xf32>
    %c1_10 = arith.constant 1 : index
    %29 = memref.load %arg5[%c1_10] : memref<2xf32, #tpu.memory_space<smem>>
    %30 = vector.broadcast %29 : f32 to vector<1x256xf32>
    %31 = arith.mulf %30, %28 : vector<1x256xf32>
    %32 = arith.addf %18, %31 : vector<1x256xf32>
    %33 = arith.negf %32 : vector<1x256xf32>
    %34 = math.exp %33 : vector<1x256xf32>
    %cst_11 = arith.constant 1.000000e+00 : f32
    %35 = vector.broadcast %cst_11 : f32 to vector<1x256xf32>
    %36 = arith.addf %35, %34 : vector<1x256xf32>
    %37 = arith.divf %35, %36 : vector<1x256xf32>
    %38 = vector.broadcast %37 : vector<1x256xf32> to vector<8x256xf32>
    %39 = arith.mulf %1, %38 : vector<8x256xf32>
    %c0_12 = arith.constant 0 : index
    %c0_13 = arith.constant 0 : index
    %c0_14 = arith.constant 0 : index
    %40 = vector.load %arg7[%c0_12, %c0_13, %c0_14] : memref<1x8x256xf32, #tpu.memory_space<vmem>>, vector<1x8x256xf32>
    %41 = vector.shape_cast %40 : vector<1x8x256xf32> to vector<8x256xf32>
    %42 = vector.shape_cast %39 : vector<8x256xf32> to vector<1x8x256xf32>
    tpu.vector_store %arg7[%c0_12, %c0_13, %c0_14], %42 {strides = array<i32>} : memref<1x8x256xf32, #tpu.memory_space<vmem>>, vector<1x8x256xf32>,
    %c0_15 = arith.constant 0 : index
    %c0_16 = arith.constant 0 : index
    %c0_17 = arith.constant 0 : index
    %43 = vector.load %arg8[%c0_15, %c0_16, %c0_17] : memref<1x1x256xf32, #tpu.memory_space<vmem>>, vector<1x1x256xf32>
    %44 = vector.shape_cast %43 : vector<1x1x256xf32> to vector<1x256xf32>
    %45 = vector.shape_cast %37 : vector<1x256xf32> to vector<1x1x256xf32>
    tpu.vector_store %arg8[%c0_15, %c0_16, %c0_17], %45 {strides = array<i32>} : memref<1x1x256xf32, #tpu.memory_space<vmem>>, vector<1x1x256xf32>,
    return
  }
  func.func @transform_0(%arg0: i32, %arg1: i32) -> (i32, i32, i32) {
    %c0_i32 = arith.constant 0 : i32
    %c0_i32_0 = arith.constant 0 : i32
    return %arg0, %c0_i32, %arg1 : i32, i32, i32
  }
  func.func @transform_1(%arg0: i32, %arg1: i32) -> (i32, i32) {
    %c0_i32 = arith.constant 0 : i32
    %c0_i32_0 = arith.constant 0 : i32
    %c0_i32_1 = arith.constant 0 : i32
    return %c0_i32, %c0_i32_0 : i32, i32
  }
  func.func @transform_2(%arg0: i32, %arg1: i32) -> i32 {
    %c0_i32 = arith.constant 0 : i32
    %c0_i32_0 = arith.constant 0 : i32
    return %c0_i32 : i32
  }
  func.func @transform_3(%arg0: i32, %arg1: i32) -> i32 {
    %c0_i32 = arith.constant 0 : i32
    %c0_i32_0 = arith.constant 0 : i32
    return %c0_i32 : i32
  }
  func.func @transform_4(%arg0: i32, %arg1: i32) -> i32 {
    %c0_i32 = arith.constant 0 : i32
    %c0_i32_0 = arith.constant 0 : i32
    return %c0_i32 : i32
  }
  func.func @transform_5(%arg0: i32, %arg1: i32) -> (i32, i32, i32) {
    %c0_i32 = arith.constant 0 : i32
    %c0_i32_0 = arith.constant 0 : i32
    return %arg0, %c0_i32, %arg1 : i32, i32, i32
  }
  func.func @transform_6(%arg0: i32, %arg1: i32) -> (i32, i32, i32) {
    %c0_i32 = arith.constant 0 : i32
    %c0_i32_0 = arith.constant 0 : i32
    return %arg0, %c0_i32, %arg1 : i32, i32, i32
  }
}

</mosaic_0001>

<bundles_post_ra>
// kernel: attention_module.1
= control target key start
LH: loop header
LB: loop body
LE: loop exit
PB: predicated region body
PF: predicated region fallthrough
CT: control target
= control target key end

     0   :  { %s884_s0 = inlined_call_operand.vmem [shape: f32[2,8,256], index: 0, kind: input, shape index: {}]   ;;  %s885_s1 = inlined_call_operand.vmem [shape: f32[8,2], index: 1, kind: input, shape index: {}]   ;;  %s886_s2 = inlined_call_operand.vmem [shape: f32[2], index: 2, kind: input, shape index: {}]   ;;  %s887_s3 = inlined_call_operand.vmem [shape: f32[2], index: 3, kind: input, shape index: {}]   ;;  %s888_s4 = inlined_call_operand.<no memory space> [shape: f32[1], index: 4, kind: input, shape index: {}]   ;;  %s889_s5 = inlined_call_operand.vmem [shape: f32[2,8,256], index: 5, kind: output, shape index: {0}]   ;;  %s890_s6 = inlined_call_operand.vmem [shape: f32[2,1,256], index: 6, kind: output, shape index: {1}]  }
   0x1   :  { %12 = sst [smem:[#allocation2]] %s888_s4 }
   0x2   :  { %13 = vsyncpa [#allocation4], 0 }
   0x3   :  { %14 = vsyncpa [#allocation6], 0  ;;  %s784_s23 = smov 0   ;;  %s786_s24 = smov 0  }
   0x4   :  { %s788_s25 = smov 0  }
   0x5 LB: > { %s599_s4 = sadd.s32 4294967295, %s739_s25   ;;  %s32_s26 = sadd.s32 1, %s735_s24  ;;  %s739_s25 = sphi %s788_s25, %s20_s25   ;;  %s735_s24 = sphi %s786_s24, %s900_s24   ;;  %s731_s23 = sphi %s784_s23, %s899_s23  }
   0x6   : > { %p34_p0 = scmp.ge.s32.totalorder %s32_s26, 2  ;;  %p601_p1 = scmp.ge.s32.totalorder %s739_s25, 1 }
   0x7   : > { %p205_p2 = scmp.lt.s32.totalorder %s739_s25, 3  ;;  %p809_p4 = scmp.eq.s32.totalorder %s599_s4, 0 }
   0x8   : > { %s902_s26 = smov (%p34_p0, %s32_s26), 0  ;;  %s221_s7 = sshll.u32 %s886_s2, 4  ;;  %s222_s7 = int_to_ptr.vmem [resolvable:$true] %s221_s7 }
   0x9   : > { %p805_p3 = pnand %p601_p1, %p205_p2  ;;  %s232_s10 = sshll.u32 %s887_s3, 4  ;;  %s233_s10 = int_to_ptr.vmem [resolvable:$true] %s232_s10 }
   0xa   : > { %s895_s28 = scalar_select %p809_p4, 1, 0 }
   0xb   : > { %s894_s27 = scalar_select %p805_p3, 1, 0 }
   0xc   : > { %p629_p5 = pneg %p805_p3  ;;  %s679_s12 = scalar_lea.vmem %s222_s7, 16 }
   0xd   : > { %p680_p7 = scmp.ne.s32.totalorder %s222_s7, %s679_s12  ;;  %p687_p11 = scmp.lt.s32.totalorder %s222_s7, %s222_s7 }
   0xe   : > { %p823_p6 = pnand %p809_p4, %p629_p5  ;;  %p688_p12 = scmp.lt.s32.totalorder %s679_s12, %s679_s12 }
  0x10   : > { %p681_p8 = pneg %p823_p6  ;;  %p689_p13 = por %p688_p12, %p687_p11 }
  0x12   : > { %p682_p9 = pnand %p681_p8, %p680_p7 }
  0x14   : > { %p683_p10 = pneg %p682_p9 }
  0x16   : > { %p690_p0 = pnand %p689_p13, %p683_p10 }
  0x18   : > { %693 = shalt.err (!%p690_p0)
}
  0x19   : > { %s741_s13 = smov [#allocation3]   ;;  %s694_s14 = scalar_lea.vmem %s233_s10, 16 }
  0x1a   : > { %632 = dma.vmem_to_smem (!%p823_p6), %s222_s7, 16, %s741_s13, [#allocation4]  }
  0x1b   : > { %p695_p1 = scmp.ne.s32.totalorder %s233_s10, %s694_s14  ;;  %p702_p4 = scmp.lt.s32.totalorder %s233_s10, %s233_s10 }
  0x1c   : > { %p703_p3 = scmp.lt.s32.totalorder %s694_s14, %s694_s14 }
  0x1d   : > { %p697_p2 = pnand %p695_p1, %p681_p8 }
  0x1e   : > { %p704_p7 = por %p703_p3, %p702_p4 }
  0x1f   : > { %p698_p5 = pneg %p697_p2 }
  0x21   : > { %p705_p9 = pnand %p704_p7, %p698_p5 }
  0x23   : > { %708 = shalt.err (!%p705_p9)
}
  0x24   : > { %s742_s15 = smov [#allocation5]   ;;  %p897_p10 = scmp.ne.s32.totalorder %s894_s27, 0 }
  0x25   : > { %635 = dma.vmem_to_smem (!%p823_p6), %s233_s10, 16, %s742_s15, [#allocation6]  }
  0x26   : > { %261 = sbr.rel (%p897_p10) target bundleno = 241 (0xf1), region = 40  ;;  %p898_p11 = scmp.ne.s32.totalorder (!%p897_p10), %s895_s28, 0 }
  0x2d   : > { %722 = dma.done.wait (%p898_p11), [#allocation4], 16  }
  0x2e   : > { %724 = vsyncadd (%p898_p11), [#allocation4], 4294967280 }
  0x2f   : > { %726 = dma.done.wait (%p898_p11), [#allocation6], 16  }
  0x30   : > { %728 = vsyncadd (%p898_p11), [#allocation6], 4294967280 }
  0x31   : > { %271 = sfence }
  0x32   : > { %v343_v0 = vld [vmem:[%s885_s1] sm:$0xff]  ;;  %v743_v1 = vmov 0   ;;  %v744_v2 = vmov 1   ;;  %p313_p3 = scmp.lt.s32.totalorder %s731_s23, 1  ;;  %s365_s22 = sld [smem:[#allocation3]] }
  0x33   : > { %669 = vset.pattern.permute.xlu0 %v743_v1  ;;  %s371_s4 = sld [smem:[#allocation5]]  ;;  %s613_s27 = sld [smem:[#allocation3 + $0x1]]  ;;  %v745_v62 = vmov 1966171168  }
  0x34   : > { %348 = vperm.xlu0 %669, %v343_v0   ;;  %s904_s23 = smov (!%p313_p3, %s731_s23), 1  ;;  %s344_s28 = sld [smem:[#allocation2]]  ;;  %v427_v63 = vunpack.c.l.s4 %v745_v62 }
  0x35   : > { %s619_s18 = sshll.u32 %s904_s23, 4  ;;  %s614_s29 = sld [smem:[#allocation5 + $0x1]] }
  0x36   : > { %s320_s21 = scalar_lea.vmem %s884_s0, %s619_s18  ;;  %v428_v1 = vunpack.c.0.s8 %v427_v63  ;;  %s330_s8 = scalar_lea.vmem %s889_s5, %s619_s18 }
  0x37   : > { %v856_v3 = vld [vmem:[%s320_s21] sm:$0xff]  ;;  %v858_v4 = vld [vmem:[%s320_s21 + $0x8] sm:$0xff]  ;;  %s612_s9 = sshll.u32 %s904_s23, 1 }
  0x38   : > { %670 = vset.pattern.permute.xlu0 %v744_v2  ;;  %v366_v25 = vstv %s365_s22  ;;  %s339_s12 = scalar_lea.vmem %s890_s6, %s612_s9 }
  0x39   : > { %378 = vperm.xlu0 %670, %v343_v0   ;;  %v372_v36 = vstv %s371_s4  ;;  %v396_v39 = vstv %s613_s27  ;;  %v429_v0 = vlaneseq }
  0x3a   : > { %v345_v46 = vstv %s344_s28 }
  0x3b   : > { %v402_v47 = vstv %s614_s29  ;;  %v430_v2 = vshrl.u32 %v429_v0, 7  ;;  %vm443_vm0 = vcmp.lt.s32.totalorder %v429_v0, 256 }
  0xb3   : > { %v349_v5 = vpop.permute.xlu0 %348 }
  0xb4   : > { %v351_v6 = vmul.f32 %v349_v5, %v856_v3  ;;  %v352_v7 = vmul.f32 %v349_v5, %v858_v4 }
  0xb6   : > { %v353_v8 = vrot.slane %v351_v6, 4  ;;  %v359_v9 = vrot.slane %v352_v7, 4 }
  0xb8   : > { %v354_v10 = vadd.f32 %v353_v8, %v351_v6  ;;  %v360_v11 = vadd.f32 %v359_v9, %v352_v7  ;;  %v379_v12 = vpop.permute.xlu0 %378  ;;  %v431_v6 = vsub.s32 %v428_v1, %v430_v2 }
  0xb9   : > { %v381_v13 = vmul.f32 %v379_v12, %v856_v3  ;;  %v382_v14 = vmul.f32 %v379_v12, %v858_v4 }
  0xba   : > { %v355_v15 = vrot.slane %v354_v10, 2  ;;  %v361_v16 = vrot.slane %v360_v11, 2 }
  0xbb   : > { %v383_v17 = vrot.slane %v381_v13, 4  ;;  %v389_v18 = vrot.slane %v382_v14, 4 }
  0xbc   : > { %v356_v19 = vadd.f32 %v355_v15, %v354_v10  ;;  %v362_v20 = vadd.f32 %v361_v16, %v360_v11 }
  0xbd   : > { %v384_v21 = vadd.f32 %v383_v17, %v381_v13  ;;  %v390_v22 = vadd.f32 %v389_v18, %v382_v14 }
  0xbe   : > { %v357_v23 = vrot.slane %v356_v19, 1  ;;  %v363_v24 = vrot.slane %v362_v20, 1 }
  0xbf   : > { %v385_v26 = vrot.slane %v384_v21, 2  ;;  %v391_v27 = vrot.slane %v390_v22, 2 }
  0xc0   : > { %v358_v28 = vadd.f32 %v357_v23, %v356_v19  ;;  %v364_v29 = vadd.f32 %v363_v24, %v362_v20 }
  0xc1   : > { %v386_v30 = vadd.f32 %v385_v26, %v384_v21  ;;  %v392_v31 = vadd.f32 %v391_v27, %v390_v22 }
  0xc2   : > { %v367_v32 = vadd.f32 %v366_v25, %v358_v28  ;;  %v368_v33 = vadd.f32 %v366_v25, %v364_v29 }
  0xc3   : > { %v387_v34 = vrot.slane %v386_v30, 1  ;;  %v393_v35 = vrot.slane %v392_v31, 1 }
  0xc4   : > { %v369_v37 = vmax.f32 %v367_v32, 0.0  ;;  %v370_v38 = vmax.f32 %v368_v33, 0.0 }
  0xc5   : > { %v388_v40 = vadd.f32 %v387_v34, %v386_v30  ;;  %v394_v41 = vadd.f32 %v393_v35, %v392_v31 }
  0xc6   : > { %v373_v42 = vmul.f32 %v372_v36, %v369_v37  ;;  %v374_v43 = vmul.f32 %v372_v36, %v370_v38 }
  0xc7   : > { %v397_v44 = vadd.f32 %v396_v39, %v388_v40  ;;  %v398_v45 = vadd.f32 %v396_v39, %v394_v41 }
  0xc8   : > { %v375_v50 = vadd.f32 %v373_v42, %v345_v46  ;;  %v376_v51 = vadd.f32 %v374_v43, %v345_v46 }
  0xc9   : > { %v399_v48 = vmax.f32 %v397_v44, 0.0  ;;  %v400_v49 = vmax.f32 %v398_v45, 0.0 }
  0xcb   : > { %v403_v52 = vmul.f32 %v402_v47, %v399_v48  ;;  %v404_v53 = vmul.f32 %v402_v47, %v400_v49 }
  0xcd   : > { %v405_v54 = vadd.f32 %v403_v52, %v375_v50  ;;  %v406_v55 = vadd.f32 %v404_v53, %v376_v51 }
  0xcf   : > { %v615_v56 = vmul.f32 -1.442695, %v405_v54  ;;  %v616_v57 = vmul.f32 -1.442695, %v406_v55 }
  0xd1   : > { %671 = vpow2.f32 %v615_v56 }
  0xd2   : > { %673 = vpow2.f32 %v616_v57 }
  0xdb   : > { %v672_v58 = vpop.eup %671 }
  0xdc   : > { %v674_v59 = vpop.eup %673  ;;  %v413_v60 = vadd.f32 1.0, %v672_v58 }
  0xdd   : > { %v414_v61 = vadd.f32 1.0, %v674_v59 }
  0xde   : > { %675 = vrcp.f32 %v413_v60 }
  0xdf   : > { %677 = vrcp.f32 %v414_v61 }
  0xe8   : > { %v676_v5 = vpop.eup %675 }
  0xe9   : > { %v678_v7 = vpop.eup %677  ;;  %v419_v8 = vmul.f32 %v676_v5, %v856_v3 }
  0xea   : > { %v420_v9 = vmul.f32 %v678_v7, %v858_v4  ;;  %v425_v10 = vcombine.low %v676_v5, %v678_v7 }
  0xeb   : > { %421 = vst [vmem:[%s330_s8] sm:$0xff] %v419_v8 }
  0xec   : > { %422 = vst [vmem:[%s330_s8 + $0x8] sm:$0xff] %v420_v9  ;;  %v432_v11 = vrot.slane %v425_v10, %v431_v6 }
  0xee   : > { %v439_v12 = vrot.slane %v432_v11, %v431_v6 }
  0xf0   : > { %445 = vst.msk [vmem:[%s339_s12] sm:$0x3] %vm443_vm0, %v439_v12 }
  0xf1 PF: > { %s20_s25 = sadd.s32 1, %s739_s25   ;;  %s899_s23 = smov %s735_s24 }
  0xf2   : > { %p17_p4 = scmp.ge.s32.totalorder %s20_s25, 4   ;;  %s900_s24 = smov %s902_s26 }
  0xf4   :  { %19 = sbr.rel (!%p17_p4) target bundleno = 5 (0x5), region = 91 }
  0xfb   :  { %499 = vsyncpa [#allocation4], 1 }
  0xfc   :  { %501 = vsyncpa [#allocation4 + $0x1], 1 }
  0xfd   :  { %502 = vsyncpa [#allocation6], 1 }

</bundles_post_ra>
